<compile_context>
chip_gen: v5e
topology: v5e:2x2
jax: 0.10.0
libtpu: 0.0.40
codegen_flags: <defaults>
</compile_context>

<pallas_src>
import functools

import jax
import jax.numpy as jnp
import numpy as np
from jax import lax
from jax.experimental import pallas as pl
from jax.experimental.pallas import tpu as pltpu

_VMEM_LIMIT = 60 * 1024 * 1024  # < 64 MiB physical (v7x), > 16/32 MiB defaults


def _choose_row_tile(n):
  """Largest row tile keeping blocks (8,128)- and int8 (32,128)-aligned."""
  for t in (256, 128):
    if n % t == 0:
      return t
  return n  # fall back to a single full-size block (small graphs)


# --------------------------- projection kernel ------------------------------
def _proj_kernel(x_ref, w_ref, wl_t_ref, ar_ref, g_ref, sl_ref, sr_ref):
  x = x_ref[...]                                             # (Tp, F_in) f32
  # g = x @ W for all heads in one matmul                      (Tp, H*F)
  g = jnp.dot(x, w_ref[...], preferred_element_type=jnp.float32)
  # left scores directly head-major: sl[h, i] = a_l . g_i^{(h)}  (a_l folded)
  sl = lax.dot_general(wl_t_ref[...], x, (((1,), (1,)), ((), ())),
                       preferred_element_type=jnp.float32)   # (H, Tp)
  # right scores via block-diagonal a_r: sr[h, j] = a_r . g_j^{(h)}
  sr = lax.dot_general(ar_ref[...], g, (((1,), (1,)), ((), ())),
                       preferred_element_type=jnp.float32)   # (H, Tp)
  g_ref[...] = g.astype(jnp.bfloat16)   # bf16 operand for the PV matmul
  sl_ref[...] = sl
  sr_ref[...] = sr


def _project(x, w, wl_t, ar_block):
  n, f_in = x.shape
  hf = w.shape[1]
  nh = wl_t.shape[0]
  tp = _choose_row_tile(n)
  cp = pltpu.CompilerParams(dimension_semantics=("parallel",),
                            vmem_limit_bytes=_VMEM_LIMIT)
  return pl.pallas_call(
      _proj_kernel,
      grid=(n // tp,),
      in_specs=[
          pl.BlockSpec((tp, f_in), lambda p: (p, 0)),   # node features, tiled
          pl.BlockSpec((f_in, hf), lambda p: (0, 0)),   # W (resident)
          pl.BlockSpec((nh, f_in), lambda p: (0, 0)),   # folded a_l (resident)
          pl.BlockSpec((nh, hf), lambda p: (0, 0)),     # block-diag a_r
      ],
      out_specs=(
          pl.BlockSpec((tp, hf), lambda p: (p, 0)),     # g   (N, H*F) bf16
          pl.BlockSpec((nh, tp), lambda p: (0, p)),     # sl  (H, N)
          pl.BlockSpec((nh, tp), lambda p: (0, p)),     # sr  (H, N)
      ),
      out_shape=(
          jax.ShapeDtypeStruct((n, hf), jnp.bfloat16),
          jax.ShapeDtypeStruct((nh, n), jnp.float32),
          jax.ShapeDtypeStruct((nh, n), jnp.float32),
      ),
      compiler_params=cp,
  )(x, w, wl_t, ar_block)


# ---------------------------- attention kernel ------------------------------
def _attn_kernel(sl_ref, sr_ref, g_ref, adj_ref, out_ref, *,
                 n_heads, f_head, apply_elu, slope):
  sl = sl_ref[...]                       # (H, Tm)  f32 left scores (row tile)
  sr = sr_ref[...]                       # (H, N)   f32 right scores (all j)
  adj = adj_ref[...]                     # (Tm, N)  int8 adjacency block

  # Logits for all heads at once, lane-dense on the neighbor axis.
  e = sl[:, :, None] + sr[:, None, :]                       # (H, Tm, N)
  e = jnp.maximum(e, slope * e)                             # LeakyReLU (0<slope<1)
  bias = (adj.astype(jnp.float32) - 1.0) * jnp.float32(1e30)  # 0 / -1e30
  e = e + bias[None, :, :]

  # Exact row softmax (the full neighbor axis lives in this tile).
  m = jnp.max(e, axis=2, keepdims=True)
  p = jnp.exp(e - m)
  denom = jnp.sum(p, axis=2, keepdims=True)
  a = (p * pl.reciprocal(denom, approx=True)).astype(jnp.bfloat16)

  # PV: bf16 MXU operands, f32 accumulation.  Per-head output width (f_head)
  # is below one MXU tile, so a per-head loop costs the same MXU passes as a
  # block-diagonal stack; only the small (N, f_head) g slices are narrow.
  g = g_ref[...]                                            # (N, H*f_head) bf16
  outs = [jnp.dot(a[hh], g[:, hh * f_head:(hh + 1) * f_head],
                  preferred_element_type=jnp.float32)
          for hh in range(n_heads)]
  out = outs[0] if n_heads == 1 else jnp.concatenate(outs, axis=1)
  if apply_elu:
    out = jnp.where(out > 0, out, jnp.exp(out) - 1.0)       # ELU(alpha=1)
  out_ref[...] = out.astype(out_ref.dtype)                  # one lane-dense store


def _attend(sl, sr, g, adj_i8, *, n_heads, f_head, apply_elu, slope):
  nh, n = sr.shape
  hf = n_heads * f_head
  tm = _choose_row_tile(n)
  grid_m = n // tm
  mask_kwargs = {}
  if grid_m > 2:
    # Deeper pipelining on the dominant (adjacency) DMA stream (v5e HBM BW).
    mask_kwargs["pipeline_mode"] = pl.Buffered(3)
  kernel = functools.partial(_attn_kernel, n_heads=n_heads, f_head=f_head,
                             apply_elu=apply_elu, slope=slope)
  cp = pltpu.CompilerParams(dimension_semantics=("parallel",),
                            vmem_limit_bytes=_VMEM_LIMIT)
  return pl.pallas_call(
      kernel,
      grid=(grid_m,),
      in_specs=[
          pl.BlockSpec((nh, tm), lambda i: (0, i)),              # sl row tile
          pl.BlockSpec((nh, n), lambda i: (0, 0)),               # sr (resident)
          pl.BlockSpec((n, hf), lambda i: (0, 0)),               # g bf16 (resident)
          pl.BlockSpec((tm, n), lambda i: (i, 0), **mask_kwargs),  # int8 adj, streamed
      ],
      out_specs=pl.BlockSpec((tm, hf), lambda i: (i, 0)),
      out_shape=jax.ShapeDtypeStruct((n, hf), jnp.float32),
      compiler_params=cp,
  )(sl, sr, g, adj_i8)


# ------------------------------- full model ---------------------------------
def gat_forward(x, adj_mat, params, *, n_heads, n_hidden, n_classes,
                negative_slope=0.2):
  n, f_in = x.shape
  f1 = n_hidden // n_heads
  # int8 adjacency: 4x smaller HBM/VMEM stream than an f32 additive mask.
  adj_i8 = (adj_mat[:, :, 0] != 0).astype(jnp.int8)

  w1, a1_l, a1_r = params["w1"], params["a1_l"], params["a1_r"]
  w2, a2_l, a2_r = params["w2"], params["a2_l"], params["a2_r"]

  # Fold the shared left attention vector a_l into an (H, F_in) matrix so the
  # projection kernel emits head-major left scores directly (no transposes).
  wl1_t = jnp.einsum("ihf,f->hi", w1.reshape(f_in, n_heads, f1), a1_l)
  # Block-diagonal a_r: one dot_general gives all heads' right scores (H, N).
  ar1_block = jnp.kron(jnp.eye(n_heads, dtype=jnp.float32),
                       a1_r.reshape(1, f1))
  wl2_t = (w2 @ a2_l).reshape(1, n_hidden)
  ar2_block = a2_r.reshape(1, n_classes)

  # ---- Layer 1 (H heads, concat, fused ELU) ----
  g1, sl1, sr1 = _project(x, w1, wl1_t, ar1_block)
  h1 = _attend(sl1, sr1, g1, adj_i8, n_heads=n_heads, f_head=f1,
               apply_elu=True, slope=negative_slope)
  # ---- Layer 2 (single head, n_classes features) ----
  g2, sl2, sr2 = _project(h1, w2, wl2_t, ar2_block)
  return _attend(sl2, sr2, g2, adj_i8, n_heads=1, f_head=n_classes,
                 apply_elu=False, slope=negative_slope)


# ---------------- pure-JAX reference (for correctness check) ----------------
def gat_layer_ref(x, w, a_l, a_r, adj, *, n_heads, f_head, apply_elu, slope=0.2):
  n = x.shape[0]
  g = (x @ w).reshape(n, n_heads, f_head)
  sl = jnp.einsum("nhf,f->nh", g, a_l)
  sr = jnp.einsum("nhf,f->nh", g, a_r)
  e = sl[:, None, :] + sr[None, :, :]
  e = jnp.where(e >= 0, e, slope * e)
  e = jnp.where(adj[:, :, None] == 0, -jnp.inf, e)
  a = jax.nn.softmax(e, axis=1)
  res = jnp.einsum("ijh,jhf->ihf", a, g).reshape(n, n_heads * f_head)
  if apply_elu:
    res = jnp.where(res > 0, res, jnp.exp(res) - 1.0)
  return res


def gat_forward_ref(x, adj_mat, params, *, n_heads, n_hidden, n_classes):
  adj = adj_mat[:, :, 0]
  h = gat_layer_ref(x, params["w1"], params["a1_l"], params["a1_r"], adj,
                    n_heads=n_heads, f_head=n_hidden // n_heads, apply_elu=True)
  return gat_layer_ref(h, params["w2"], params["a2_l"], params["a2_r"], adj,
                       n_heads=1, f_head=n_classes, apply_elu=False)


if __name__ == "__main__":
  N = 32            # nodes
  in_features = 16
  n_hidden = 32
  n_heads = 4
  n_classes = 8

  key = jax.random.PRNGKey(0)
  kx, kadj, k1, k2, k3, k4 = jax.random.split(key, 6)

  # Inputs
  x = jax.random.normal(kx, (N, in_features), dtype=jnp.float32)
  adj = (jax.random.uniform(kadj, (N, N)) < 0.3).astype(jnp.float32)
  adj = jnp.maximum(adj, jnp.eye(N, dtype=jnp.float32))     # self-loops
  adj_mat = adj[:, :, None]                                  # (N, N, 1)

  # Deterministic parameters (torch Linear-style uniform init, no bias)
  f1 = n_hidden // n_heads

  def uinit(k, shape, fan_in):
    b = 1.0 / np.sqrt(fan_in)
    return jax.random.uniform(k, shape, jnp.float32, -b, b)

  a1 = uinit(k2, (2 * f1,), 2 * f1)
  a2 = uinit(k4, (2 * n_classes,), 2 * n_classes)
  params = {
      "w1": uinit(k1, (in_features, n_hidden), in_features),
      "a1_l": a1[:f1], "a1_r": a1[f1:],
      "w2": uinit(k3, (n_hidden, n_classes), n_hidden),
      "a2_l": a2[:n_classes], "a2_r": a2[n_classes:],
  }

  out = gat_forward(x, adj_mat, params,
                    n_heads=n_heads, n_hidden=n_hidden, n_classes=n_classes)
  out = jax.block_until_ready(out)

  ref = gat_forward_ref(x, adj_mat, params,
                        n_heads=n_heads, n_hidden=n_hidden, n_classes=n_classes)
  ref = jax.block_until_ready(ref)

  assert out.shape == (N, n_classes), out.shape
  # tolerance accounts for bf16 PV-matmul operands (MXU-native) plus
  # pl.reciprocal(approx=True) in the softmax, propagated through two layers
  np.testing.assert_allclose(np.asarray(out), np.asarray(ref),
                             rtol=1e-2, atol=1e-2)
  print("KERNEL_OK")
</pallas_src>

<mosaic_0001>
module attributes {stable_mosaic.version = 11 : i64} {
  func.func @_proj_kernel(%arg0: i32, %arg1: memref<32x16xf32, #tpu.memory_space<vmem>>, %arg2: memref<16x32xf32, #tpu.memory_space<vmem>>, %arg3: memref<4x16xf32, #tpu.memory_space<vmem>>, %arg4: memref<4x32xf32, #tpu.memory_space<vmem>>, %arg5: memref<32x32xbf16, #tpu.memory_space<vmem>>, %arg6: memref<4x32xf32, #tpu.memory_space<vmem>>, %arg7: memref<4x32xf32, #tpu.memory_space<vmem>>) attributes {dimension_semantics = [#tpu.dimension_semantics<parallel>], iteration_bounds = array<i64: 1>, scalar_prefetch = 0 : i64, scratch_operands = 0 : i64, tpu.core_type = #tpu.core_type<tc>, window_params = [{transform_indices = @transform_0, window_bounds = array<i64: 32, 16>}, {pipeline_mode = #tpu.pipeline_mode<synchronous>, transform_indices = @transform_1, window_bounds = array<i64: 16, 32>}, {pipeline_mode = #tpu.pipeline_mode<synchronous>, transform_indices = @transform_2, window_bounds = array<i64: 4, 16>}, {pipeline_mode = #tpu.pipeline_mode<synchronous>, transform_indices = @transform_3, window_bounds = array<i64: 4, 32>}, {transform_indices = @transform_4, window_bounds = array<i64: 32, 32>}, {transform_indices = @transform_5, window_bounds = array<i64: 4, 32>}, {transform_indices = @transform_6, window_bounds = array<i64: 4, 32>}]} {
    %c0 = arith.constant 0 : index
    %c0_0 = arith.constant 0 : index
    %0 = vector.load %arg1[%c0, %c0_0] : memref<32x16xf32, #tpu.memory_space<vmem>>, vector<32x16xf32>
    %c0_1 = arith.constant 0 : index
    %c0_2 = arith.constant 0 : index
    %1 = vector.load %arg2[%c0_1, %c0_2] : memref<16x32xf32, #tpu.memory_space<vmem>>, vector<16x32xf32>
    %cst = arith.constant dense<0.000000e+00> : vector<32x32xf32>
    %2 = tpu.matmul %0, %1, %cst {dimension_numbers = #tpu.dot_dimension_numbers<[1], [0], [0], [1], [0, 0, 1, 1], [], []>} : vector<32x16xf32>, vector<16x32xf32>, vector<32x32xf32> -> vector<32x32xf32>
    %c0_3 = arith.constant 0 : index
    %c0_4 = arith.constant 0 : index
    %3 = vector.load %arg3[%c0_3, %c0_4] : memref<4x16xf32, #tpu.memory_space<vmem>>, vector<4x16xf32>
    %cst_5 = arith.constant dense<0.000000e+00> : vector<4x32xf32>
    %4 = tpu.matmul %3, %0, %cst_5 {dimension_numbers = #tpu.dot_dimension_numbers<[1], [1], [0], [0], [0, 0, 1, 0], [], []>} : vector<4x16xf32>, vector<32x16xf32>, vector<4x32xf32> -> vector<4x32xf32>
    %c0_6 = arith.constant 0 : index
    %c0_7 = arith.constant 0 : index
    %5 = vector.load %arg4[%c0_6, %c0_7] : memref<4x32xf32, #tpu.memory_space<vmem>>, vector<4x32xf32>
    %cst_8 = arith.constant dense<0.000000e+00> : vector<4x32xf32>
    %6 = tpu.matmul %5, %2, %cst_8 {dimension_numbers = #tpu.dot_dimension_numbers<[1], [1], [0], [0], [0, 0, 1, 0], [], []>} : vector<4x32xf32>, vector<32x32xf32>, vector<4x32xf32> -> vector<4x32xf32>
    %7 = arith.truncf %2 : vector<32x32xf32> to vector<32x32xbf16>
    %c0_9 = arith.constant 0 : index
    %c0_10 = arith.constant 0 : index
    %8 = vector.load %arg5[%c0_9, %c0_10] : memref<32x32xbf16, #tpu.memory_space<vmem>>, vector<32x32xbf16>
    tpu.vector_store %arg5[%c0_9, %c0_10], %7 {strides = array<i32>} : memref<32x32xbf16, #tpu.memory_space<vmem>>, vector<32x32xbf16>,
    %c0_11 = arith.constant 0 : index
    %c0_12 = arith.constant 0 : index
    %9 = vector.load %arg6[%c0_11, %c0_12] : memref<4x32xf32, #tpu.memory_space<vmem>>, vector<4x32xf32>
    tpu.vector_store %arg6[%c0_11, %c0_12], %4 {strides = array<i32>} : memref<4x32xf32, #tpu.memory_space<vmem>>, vector<4x32xf32>,
    %c0_13 = arith.constant 0 : index
    %c0_14 = arith.constant 0 : index
    %10 = vector.load %arg7[%c0_13, %c0_14] : memref<4x32xf32, #tpu.memory_space<vmem>>, vector<4x32xf32>
    tpu.vector_store %arg7[%c0_13, %c0_14], %6 {strides = array<i32>} : memref<4x32xf32, #tpu.memory_space<vmem>>, vector<4x32xf32>,
    return
  }
  func.func @transform_0(%arg0: i32) -> (i32, i32) {
    %c0_i32 = arith.constant 0 : i32
    %c0_i32_0 = arith.constant 0 : i32
    return %arg0, %c0_i32 : i32, i32
  }
  func.func @transform_1(%arg0: i32) -> (i32, i32) {
    %c0_i32 = arith.constant 0 : i32
    %c0_i32_0 = arith.constant 0 : i32
    %c0_i32_1 = arith.constant 0 : i32
    return %c0_i32, %c0_i32_0 : i32, i32
  }
  func.func @transform_2(%arg0: i32) -> (i32, i32) {
    %c0_i32 = arith.constant 0 : i32
    %c0_i32_0 = arith.constant 0 : i32
    %c0_i32_1 = arith.constant 0 : i32
    return %c0_i32, %c0_i32_0 : i32, i32
  }
  func.func @transform_3(%arg0: i32) -> (i32, i32) {
    %c0_i32 = arith.constant 0 : i32
    %c0_i32_0 = arith.constant 0 : i32
    %c0_i32_1 = arith.constant 0 : i32
    return %c0_i32, %c0_i32_0 : i32, i32
  }
  func.func @transform_4(%arg0: i32) -> (i32, i32) {
    %c0_i32 = arith.constant 0 : i32
    %c0_i32_0 = arith.constant 0 : i32
    return %arg0, %c0_i32 : i32, i32
  }
  func.func @transform_5(%arg0: i32) -> (i32, i32) {
    %c0_i32 = arith.constant 0 : i32
    %c0_i32_0 = arith.constant 0 : i32
    return %c0_i32, %arg0 : i32, i32
  }
  func.func @transform_6(%arg0: i32) -> (i32, i32) {
    %c0_i32 = arith.constant 0 : i32
    %c0_i32_0 = arith.constant 0 : i32
    return %c0_i32, %arg0 : i32, i32
  }
}

</mosaic_0001>

<bundles_post_ra>
// kernel: tpu_custom_call.1
= control target key start
LH: loop header
LB: loop body
LE: loop exit
PB: predicated region body
PF: predicated region fallthrough
CT: control target
= control target key end

     0   :  { %12 = vsyncpa [#allocation3], 0  ;;  %vm28_vm0 = vcmask 130048   ;;  %s376_s0 = inlined_call_operand.vmem [shape: f32[32,16], index: 0, kind: input, shape index: {}]   ;;  %s377_s1 = inlined_call_operand.vmem [shape: f32[16,32], index: 1, kind: input, shape index: {}]   ;;  %s378_s2 = inlined_call_operand.vmem [shape: f32[4,16], index: 2, kind: input, shape index: {}]   ;;  %s379_s3 = inlined_call_operand.vmem [shape: f32[4,32], index: 3, kind: input, shape index: {}]   ;;  %s380_s4 = inlined_call_operand.hbm [shape: bf16[32,32], index: 4, kind: output, shape index: {0}]   ;;  %s381_s5 = inlined_call_operand.hbm [shape: f32[4,32], index: 5, kind: output, shape index: {1}]   ;;  %s382_s6 = inlined_call_operand.hbm [shape: f32[4,32], index: 6, kind: output, shape index: {2}]  }
   0x1   :  { %v27_v0 = vld [vmem:[%s377_s1 + $0x8] sm:$0xff]  ;;  %v26_v1 = vld [vmem:[%s377_s1] sm:$0xff]  ;;  %v25_v3 = vld [vmem:[%s376_s0 + $0x18] sm:$0xff] }
   0x2   :  { %205 = vmatpush.msra.mxu3 %v27_v0  ;;  %v23_v2 = vld [vmem:[%s376_s0 + $0x8] sm:$0xff]  ;;  %55 = vmatpush.msra.mxu0 %v27_v0  ;;  %v22_v4 = vld [vmem:[%s376_s0] sm:$0xff] }
   0x3   :  { %195 = vmatpush.xpose.msk.msra.mxu1 %vm28_vm0, %v25_v3 }
   0x4   :  { %13 = vsyncpa [#allocation5], 0  ;;  %206 = vmatpush.msra.mxu3 %v26_v1  ;;  %56 = vmatpush.msra.mxu0 %v26_v1  ;;  %v24_v5 = vld [vmem:[%s376_s0 + $0x10] sm:$0xff]  ;;  %vm135_vm1 = vcmask 257024   ;;  %v70_v9 = vld [vmem:[%s378_s2] sm:$0xf] }
   0x5   :  { %192 = vmatmul.msk.f32.vlgmr.msra.gmra.mxu3 %vm28_vm0, %v23_v2  ;;  %191 = vmatmul.msk.f32.vlgmr.msra.gmra.mxu0 %vm28_vm0, %v22_v4  ;;  %vm95_vm2 = vcmask 261120   ;;  %v94_v15 = vld [vmem:[%s379_s3] sm:$0xf]  ;;  %s148_s12 = sshll.u32 %s380_s4, 4  ;;  %s288_s13 = smov [#allocation2]   ;;  %s149_s12 = int_to_ptr.hbm [resolvable:$true] %s148_s12 }
   0x6   :  { %s146_s14 = sshll.u32 %s288_s13, 4  ;;  %s289_s15 = smov 64   ;;  %s147_s14 = int_to_ptr.vmem [resolvable:$true] %s146_s14 }
   0x7   :  { %196 = vmatpush.xpose.msk.msra.mxu1 %vm28_vm0, %v24_v5  ;;  %s290_s16 = smov 4   ;;  %s291_s17 = smov [#allocation4]  }
   0x8   :  { %s160_s18 = sshll.u32 %s291_s17, 4  ;;  %s162_s21 = sshll.u32 %s381_s5, 4  ;;  %s161_s18 = int_to_ptr.vmem [resolvable:$true] %s160_s18  ;;  %s163_s21 = int_to_ptr.hbm [resolvable:$true] %s162_s21 }
   0x9   :  { %s292_s3 = smov [#allocation6]   ;;  %s173_s24 = sshll.u32 %s382_s6, 4  ;;  %s174_s24 = int_to_ptr.hbm [resolvable:$true] %s173_s24 }
   0xa   :  { %s171_s4 = sshll.u32 %s292_s3, 4  ;;  %s172_s4 = int_to_ptr.vmem [resolvable:$true] %s171_s4 }
   0xb   :  { %197 = vmatpush.xpose.msk.msra.mxu1 %vm28_vm0, %v23_v2 }
   0xd   :  { %193 = vmatmul.msk.f32.gmra.mxu3 %vm28_vm0, %v24_v5 }
   0xf   :  { %198 = vmatpush.xpose.msk.msra.mxu1 %vm28_vm0, %v22_v4 }
  0x12   :  { %199 = vmatmul.msk.f32.vlgmr.msra.gmra.mxu1 %vm28_vm0, %v70_v9 }
  0x15   :  { %194 = vmatmul.msk.f32.gmra.mxu3 %vm28_vm0, %v25_v3 }
  0x82   :  { %v58_v6 = vpop.f32.mrf.mxu0 }
  0x83   :  { %v131_v7 = vpack.c.bf16 %v58_v6, %v58_v6 }
  0x85   :  { %136 = vst.msk [vmem:[#allocation2] sm:$0xf] %vm135_vm1, %v131_v7 }
  0x88   :  { %v61_v8 = vpop.f32.mrf.mxu3 }
  0x89   :  { %v132_v10 = vpack.c.bf16 %v61_v8, %v61_v8 }
  0x8b   :  { %137 = vst.msk [vmem:[#allocation2 + $0x4] sm:$0xf] %vm135_vm1, %v132_v10 }
  0x8f   :  { %v91_v16 = vpop.f32.mrf.mxu1 }
  0x90   :  { %v64_v11 = vpop.f32.mrf.mxu3  ;;  %140 = vst.msk [vmem:[#allocation4] sm:$0xf] %vm135_vm1, %v91_v16 }
  0x91   :  { %v133_v12 = vpack.c.bf16 %v64_v11, %v64_v11  ;;  %165 = dma.vmem_to_hbm [thread:$0]  %s161_s18, 64, %s163_s21, [#allocation5]  }
  0x93   :  { %138 = vst.msk [vmem:[#allocation2 + $0x8] sm:$0xf] %vm135_vm1, %v133_v12 }
  0x98   :  { %v67_v13 = vpop.f32.mrf.mxu3 }
  0x99   :  { %v134_v14 = vpack.c.bf16 %v67_v13, %v67_v13  ;;  %200 = vmatpush.xpose.msk.msra.mxu2 %vm95_vm2, %v67_v13 }
  0x9b   :  { %139 = vst.msk [vmem:[#allocation2 + $0xc] sm:$0xf] %vm135_vm1, %v134_v14 }
  0x9c   :  { %154 = dma.vmem_to_hbm [thread:$0]  %s147_s14, 256, %s149_s12, [#allocation3], %s289_s15, %s289_s15, %s290_s16  }
  0x9d   :  { %201 = vmatpush.xpose.msk.msra.mxu2 %vm95_vm2, %v64_v11 }
  0xa1   :  { %202 = vmatpush.xpose.msk.msra.mxu2 %vm95_vm2, %v61_v8 }
  0xa5   :  { %203 = vmatpush.xpose.msk.msra.mxu2 %vm95_vm2, %v58_v6 }
  0xa8   :  { %204 = vmatmul.msk.f32.vlgmr.msra.gmra.mxu2 %vm95_vm2, %v94_v15 }
 0x12b   :  { %v128_v17 = vpop.f32.mrf.mxu2 }
 0x12c   :  { %141 = vst.msk [vmem:[#allocation6] sm:$0xf] %vm135_vm1, %v128_v17 }
 0x12d   :  { %176 = dma.vmem_to_hbm [thread:$0]  %s172_s4, 64, %s174_s24, [#allocation5]  }
 0x12e   :  { %284 = dma.done.wait [#allocation3], 256  }
 0x12f   :  { %285 = vsyncadd [#allocation3], 4294967040 }
 0x130   :  { %286 = dma.done.wait [#allocation5], 128  }
 0x131   :  { %287 = vsyncadd [#allocation5], 4294967168 }
 0x132   :  { %189 = vsyncpa [#allocation3], 1 }
 0x133   :  { %190 = vsyncpa [#allocation5], 1 }

</bundles_post_ra>
